<compile_context>
chip_gen: v6e
topology: v6e:2x2x1
jax: 0.10.0
libtpu: 0.0.40
codegen_flags: <defaults>
</compile_context>

<pallas_src>
import jax
import jax.numpy as jnp
from jax.experimental import pallas as pl
from jax.experimental.pallas import tpu as pltpu


# ---------------------------------------------------------------------------
# small helpers
# ---------------------------------------------------------------------------
def _round_up(a, m):
    return (a + m - 1) // m * m


def _sublane_multiple(dtype):
    # 8 sublanes for 32-bit, 16 for 16-bit, 32 for 8-bit packed dtypes.
    return max(8, 32 // jnp.dtype(dtype).itemsize)


def _choose_tb(n, dtype):
    sl = _sublane_multiple(dtype)
    return max(sl, min(256, _round_up(n, sl)))


def _choose_ct(c):
    # C-tile for the streamed emb table; bounded so (TB, CT) one-hot stays small.
    return min(1024, _round_up(max(c, 1), 8))


def _vmem_limit_bytes():
    # 75% of physical VMEM: ~48 MiB on v7x (64 MiB physical), ~96 MiB on v5e/v6e.
    try:
        cap = int(pltpu.get_tpu_info().vmem_capacity_bytes)
    except Exception:
        cap = 64 * 1024 * 1024  # conservative fallback (v7x physical)
    return max(32 * 1024 * 1024, (cap * 3) // 4)


_VMEM_LIMIT = _vmem_limit_bytes()


# ---------------------------------------------------------------------------
# pull kernel (C-tiled one-hot MXU gather):
#   grid = (row blocks, C tiles); for each row i of the row block
#     out[i] = emb[slot[i]]  if slot[i] >= 0  else x[i]
# The gather is a (TB, CT) x (CT, D) matmul per C tile accumulated into a
# (TB, D) f32 scratch; rows with slot == -1 never match any column.
# ---------------------------------------------------------------------------
def _pull_kernel(slot_ref, x_ref, emb_ref, o_ref, acc_ref):
    ci = pl.program_id(1)
    ct = emb_ref.shape[0]
    tb = x_ref.shape[0]

    @pl.when(ci == 0)
    def _():
        acc_ref[...] = jnp.zeros_like(acc_ref)

    slots = slot_ref[...]                                   # (TB, 1) int32; -1 => keep x row
    rel = slots - ci * ct                                   # slot relative to this C tile
    col = jax.lax.broadcasted_iota(jnp.int32, (tb, ct), 1)  # (TB, CT)
    onehot = (col == rel).astype(jnp.float32)               # all-zero row if not in this tile
    acc_ref[...] += jnp.dot(onehot, emb_ref[...],
                            preferred_element_type=jnp.float32)

    @pl.when(ci == pl.num_programs(1) - 1)
    def _():
        o_ref[...] = jnp.where(slots >= 0,
                               acc_ref[...].astype(o_ref.dtype),
                               x_ref[...])


# ---------------------------------------------------------------------------
# push kernel (HBM->HBM row-DMA scatter, single invocation):
# emb stays in HBM (aliased in->out), x stays in HBM (pl.ANY).  For each row r
# with slot >= 0, DMA x[r] -> emb[slot].  All copies drained once at the end.
# TODO(synk): coalesce runs of consecutive slots into one larger DMA (needs
# wrapper-side sorting + static-size run chunks); currently one row per DMA.
# ---------------------------------------------------------------------------
def _push_kernel(slot_ref, x_hbm_ref, emb_in_ref, emb_out_ref, sem):
    del emb_in_ref  # same HBM buffer as emb_out_ref (input_output_aliases)
    n = slot_ref.shape[0]

    def issue(r, count):
        s = slot_ref[r]                          # SMEM scalar read

        @pl.when(s >= 0)
        def _():
            pltpu.make_async_copy(
                x_hbm_ref.at[pl.ds(r, 1), :],     # (1, D) HBM source row
                emb_out_ref.at[pl.ds(s, 1), :],   # (1, D) HBM destination row
                sem,
            ).start()

        return count + (s >= 0).astype(jnp.int32)

    n_started = jax.lax.fori_loop(0, n, issue, jnp.int32(0))

    # Drain once at the end: wait per issued row-copy (all copies have
    # identical size, so a fixed-size descriptor is fine for the wait).
    def drain(_, carry):
        pltpu.make_async_copy(
            x_hbm_ref.at[pl.ds(0, 1), :],
            emb_out_ref.at[pl.ds(0, 1), :],
            sem,
        ).wait()
        return carry

    jax.lax.fori_loop(0, n_started, drain, jnp.int32(0))


# ---------------------------------------------------------------------------
# History module (state held as JAX arrays)
# ---------------------------------------------------------------------------
class History:
    def __init__(self, cached_id, num_embeddings, embedding_dim):
        self.num_embeddings = int(num_embeddings)
        self.embedding_dim = int(embedding_dim)
        n_cached = int(cached_id.shape[0])
        emb_idx = jnp.full((self.num_embeddings,), -1, dtype=jnp.int32)
        values = jnp.arange(n_cached, dtype=jnp.int32)
        self.emb_idx = emb_idx.at[cached_id].set(values)
        self.emb = jnp.zeros((n_cached, self.embedding_dim), jnp.float32)
        self.cached_nodes = jnp.zeros((self.num_embeddings,), jnp.bool_)

    def reset_parameters(self):
        self.emb = jnp.zeros_like(self.emb)
        self.cached_nodes = jnp.zeros_like(self.cached_nodes)

    # ---------------- pull ----------------
    def pull(self, x, target_id):
        N, D = x.shape
        C = self.emb.shape[0]
        target_id = target_id.astype(jnp.int32)

        # Hoist the double indirection into O(N)-sized vectors and fold the
        # cached flag into the slot index (-1 == "keep x row").
        slots = self.emb_idx[target_id]
        cached = self.cached_nodes[target_id]
        slots = jnp.where(cached, slots, -1).astype(jnp.int32)

        tb = _choose_tb(N, x.dtype)
        npad = _round_up(N, tb)
        if npad != N:
            x = jnp.pad(x, ((0, npad - N), (0, 0)))
            slots = jnp.pad(slots, (0, npad - N), constant_values=-1)
        slots2 = slots.reshape(npad, 1)

        ct = _choose_ct(C)
        cpad = _round_up(C, ct)
        emb = self.emb
        if cpad != C:
            emb = jnp.pad(emb, ((0, cpad - C), (0, 0)))  # zero rows never matched

        out = pl.pallas_call(
            _pull_kernel,
            out_shape=jax.ShapeDtypeStruct((npad, D), x.dtype),
            grid=(npad // tb, cpad // ct),
            in_specs=[
                pl.BlockSpec((tb, 1), lambda b, c: (b, 0)),   # slots (constant over c)
                pl.BlockSpec((tb, D), lambda b, c: (b, 0)),   # x block (constant over c)
                pl.BlockSpec((ct, D), lambda b, c: (c, 0)),   # streamed emb C-tile
            ],
            out_specs=pl.BlockSpec((tb, D), lambda b, c: (b, 0)),
            scratch_shapes=[pltpu.VMEM((tb, D), jnp.float32)],
            compiler_params=pltpu.CompilerParams(
                dimension_semantics=("parallel", "arbitrary"),
                vmem_limit_bytes=int(_VMEM_LIMIT),
            ),
        )(slots2, x, emb)
        return out[:N]

    # ---------------- push ----------------
    def push(self, x, target_id):
        N, D = x.shape
        C = self.emb.shape[0]
        target_id = target_id.astype(jnp.int32)
        x = x.astype(self.emb.dtype)

        slots = self.emb_idx[target_id].astype(jnp.int32)     # (N,), -1 => skip
        valid = slots != -1

        # Dedup duplicate slots (keep the LAST occurrence, matching sequential
        # write order) so two in-flight row DMAs never target the same emb row.
        order = jnp.arange(N, dtype=jnp.int32)
        safe_slots = jnp.where(valid, slots, C)
        last_row = jnp.full((C,), -1, dtype=jnp.int32).at[safe_slots].max(
            order, mode="drop")
        keep = valid & (last_row[jnp.clip(slots, 0, max(C - 1, 0))] == order)
        slots_eff = jnp.where(keep, slots, -1).astype(jnp.int32)

        # TODO(synk): for small D / moderate N, benchmark against a plain XLA
        # scatter (emb.at[slots].set(x, mode="drop")) — 128-byte DMAs may lose.
        new_emb = pl.pallas_call(
            _push_kernel,
            out_shape=jax.ShapeDtypeStruct((C, D), self.emb.dtype),
            in_specs=[
                pl.BlockSpec(memory_space=pltpu.MemorySpace.SMEM),  # slots (N,)
                pl.BlockSpec(memory_space=pl.ANY),                  # x (HBM)
                pl.BlockSpec(memory_space=pl.ANY),                  # emb (HBM, aliased)
            ],
            out_specs=pl.BlockSpec(memory_space=pl.ANY),            # same HBM buffer
            scratch_shapes=[pltpu.SemaphoreType.DMA(())],
            input_output_aliases={2: 0},                            # emb in -> emb out
            compiler_params=pltpu.CompilerParams(
                has_side_effects=True,
                vmem_limit_bytes=int(_VMEM_LIMIT),
            ),
        )(slots_eff, x, self.emb)
        self.emb = new_emb

        # Tiny boolean flag bookkeeping stays in plain JAX.
        safe_ids = jnp.where(valid, target_id, self.num_embeddings)  # OOB -> drop
        self.cached_nodes = self.cached_nodes.at[safe_ids].set(True, mode="drop")

    def pull_push(self, x, inter_id):
        # Matches the PyTorch module: the pulled result is discarded.
        self.pull(x, inter_id)
        self.push(x, inter_id)


# ---------------------------------------------------------------------------
# pure-JAX reference for verification
# ---------------------------------------------------------------------------
def _pull_ref(x, tid, emb_idx, cached, emb):
    is_c = cached[tid]
    slot = emb_idx[tid]
    gathered = emb[jnp.where(is_c, slot, 0)]
    return jnp.where(is_c[:, None], gathered, x)


def _push_ref(x, tid, emb_idx, emb, cached, num_embeddings):
    slot = emb_idx[tid]
    should = slot != -1
    safe = jnp.where(should, slot, emb.shape[0])
    new_emb = emb.at[safe].set(x, mode="drop")
    new_cached = cached.at[jnp.where(should, tid, num_embeddings)].set(
        True, mode="drop")
    return new_emb, new_cached


if __name__ == "__main__":
    key = jax.random.PRNGKey(0)
    k1, k2 = jax.random.split(key)

    num_embeddings, D, N = 64, 32, 16
    cached_id = jnp.arange(0, 48, 2, dtype=jnp.int32)  # 24 cacheable node ids

    h = History(cached_id, num_embeddings, D)
    emb_idx0 = h.emb_idx

    # push a first batch into the history
    x1 = jax.random.normal(k1, (N, D), jnp.float32)
    ids1 = jnp.arange(N, dtype=jnp.int32)               # 0..15 (evens cacheable)
    h.push(x1, ids1)

    # pull a second batch with overlapping ids
    x2 = jax.random.normal(k2, (N, D), jnp.float32)
    ids2 = jnp.arange(8, 8 + N, dtype=jnp.int32)        # 8..23
    out = h.pull(x2, ids2)
    jax.block_until_ready(out)
    jax.block_until_ready(h.emb)

    # ---- verify against pure-JAX reference ----
    emb_r = jnp.zeros((cached_id.shape[0], D), jnp.float32)
    cached_r = jnp.zeros((num_embeddings,), jnp.bool_)
    emb_r, cached_r = _push_ref(x1, ids1, emb_idx0, emb_r, cached_r,
                                num_embeddings)
    expected = _pull_ref(x2, ids2, emb_idx0, cached_r, emb_r)

    assert jnp.allclose(out, expected), "pull mismatch"
    assert jnp.allclose(h.emb, emb_r), "push emb mismatch"
    assert bool(jnp.array_equal(h.cached_nodes, cached_r)), "cached flags mismatch"

    print("KERNEL_OK")
</pallas_src>

<mosaic_0001>
module attributes {stable_mosaic.version = 11 : i64} {
  func.func @_push_kernel(%arg0: memref<16xi32, #tpu.memory_space<smem>>, %arg1: memref<16x32xf32, #tpu.memory_space<any>>, %arg2: memref<24x32xf32, #tpu.memory_space<any>>, %arg3: memref<24x32xf32, #tpu.memory_space<any>>, %arg4: memref<!tpu.dma_semaphore, #tpu.memory_space<semaphore_mem>>) attributes {dimension_semantics = [], scalar_prefetch = 0 : i64, scratch_operands = 1 : i64, tpu.core_type = #tpu.core_type<tc>} {
    %c0_i32 = arith.constant 0 : i32
    %c0_i32_0 = arith.constant 0 : i32
    %c16_i32 = arith.constant 16 : i32
    %0 = arith.addi %c0_i32_0, %c16_i32 : i32
    %c1_i32 = arith.constant 1 : i32
    %1 = scf.for %arg5 = %c0_i32_0 to %0 step %c1_i32 iter_args(%arg6 = %c0_i32) -> (i32)  : i32 {
      %4 = arith.index_cast %arg5 : i32 to index
      %5 = memref.load %arg0[%4] : memref<16xi32, #tpu.memory_space<smem>>
      %c0_i32_5 = arith.constant 0 : i32
      %6 = arith.cmpi sge, %5, %c0_i32_5 : i32
      %7 = arith.extui %6 : i1 to i32
      %c0_i32_6 = arith.constant 0 : i32
      %8 = arith.cmpi ne, %7, %c0_i32_6 : i32
      scf.if %8 {
        %c0_i32_8 = arith.constant 0 : i32
        %12 = tpu.memref_slice %arg1[%arg5, %c0_i32_8] : memref<16x32xf32, #tpu.memory_space<any>> -> memref<1x32xf32, #tpu.memory_space<any>>
        %c0_i32_9 = arith.constant 0 : i32
        %13 = tpu.memref_slice %arg3[%5, %c0_i32_9] : memref<24x32xf32, #tpu.memory_space<any>> -> memref<1x32xf32, #tpu.memory_space<any>>
        tpu.enqueue_dma source(%12 : memref<1x32xf32, #tpu.memory_space<any>>) target(%13 : memref<1x32xf32, #tpu.memory_space<any>>) target_semaphore(%arg4 : memref<!tpu.dma_semaphore, #tpu.memory_space<semaphore_mem>>)
      } else {
      }
      %c0_i32_7 = arith.constant 0 : i32
      %9 = arith.cmpi sge, %5, %c0_i32_7 : i32
      %10 = arith.extui %9 : i1 to i32
      %11 = arith.addi %arg6, %10 : i32
      scf.yield %11 : i32
    }
    %c16_i32_1 = arith.constant 16 : i32
    %c0_i32_2 = arith.constant 0 : i32
    %c0_i32_3 = arith.constant 0 : i32
    %2 = arith.subi %1, %c0_i32_3 : i32
    %3 = arith.addi %c0_i32_3, %2 : i32
    %c1_i32_4 = arith.constant 1 : i32
    scf.for %arg5 = %c0_i32_3 to %3 step %c1_i32_4  : i32 {
      %c0_i32_5 = arith.constant 0 : i32
      %c0_i32_6 = arith.constant 0 : i32
      %4 = tpu.memref_slice %arg1[%c0_i32_5, %c0_i32_6] : memref<16x32xf32, #tpu.memory_space<any>> -> memref<1x32xf32, #tpu.memory_space<any>>
      %c0_i32_7 = arith.constant 0 : i32
      %c0_i32_8 = arith.constant 0 : i32
      %5 = tpu.memref_slice %arg3[%c0_i32_7, %c0_i32_8] : memref<24x32xf32, #tpu.memory_space<any>> -> memref<1x32xf32, #tpu.memory_space<any>>
      tpu.wait_dma2 semaphore(%arg4 : memref<!tpu.dma_semaphore, #tpu.memory_space<semaphore_mem>>) src(%4 : memref<1x32xf32, #tpu.memory_space<any>>) dst(%5 : memref<1x32xf32, #tpu.memory_space<any>>)
    }
    return
  }
}

</mosaic_0001>

<bundles_post_ra>
// kernel: tpu_custom_call.1
= control target key start
LH: loop header
LB: loop body
LE: loop exit
PB: predicated region body
PF: predicated region fallthrough
CT: control target
= control target key end

     0   :  { %8 = vsyncpa [#allocation4], 0  ;;  %s250_s0 = inlined_call_operand.vmem [shape: s32[16], index: 0, kind: input, shape index: {}]   ;;  %s251_s1 = inlined_call_operand.vmem [shape: f32[16,32], index: 1, kind: input, shape index: {}]   ;;  %s252_s2 = inlined_call_operand.hbm [shape: f32[24,32], index: 2, kind: input, shape index: {}, may-alias: {2,3}]   ;;  %s253_s3 = inlined_call_operand.hbm [shape: f32[24,32], index: 3, kind: output, shape index: {}, may-alias: {2,3}]  }
   0x1   :  { %s15_s14 = sshll.u32 %s250_s0, 4  ;;  %s16_s14 = int_to_ptr.vmem [resolvable:$true] %s15_s14 }
   0x2   :  { %s115_s15 = scalar_lea.vmem %s16_s14, 16  ;;  %p120_p1 = scmp.lt.s32.totalorder %s16_s14, %s16_s14 }
   0x3   :  { %p116_p0 = scmp.ne.s32.totalorder %s16_s14, %s115_s15  ;;  %p121_p2 = scmp.lt.s32.totalorder %s115_s15, %s115_s15 }
   0x5   :  { %p122_p3 = por %p121_p2, %p120_p1 }
   0x7   :  { %p123_p4 = pnand %p122_p3, %p116_p0 }
   0x9   :  { %126 = shalt.err (!%p123_p4)
}
   0xa   :  { %s181_s16 = smov [#allocation3]  }
   0xb   :  { %18 = dma.vmem_to_smem %s16_s14, 16, %s181_s16, [#allocation4]  }
   0xc   :  { %165 = dma.done.wait [#allocation4], 16  }
   0xd   :  { %166 = vsyncadd [#allocation4], 4294967280 }
   0xe   :  { %22 = sfence }
   0xf   :  { %s205_s2 = smov 0   ;;  %s207_s17 = smov 0  }
  0x10 LB: > { %s216_s0 = sld [smem:[#allocation3 + %s175_s17]]  ;;  %s35_s20 = scalar_lea.vmem %s251_s1, %s175_s17  ;;  %s175_s17 = sphi %s207_s17, %s28_s17   ;;  %s171_s2 = sphi %s205_s2, %s254_s2  }
  0x11   : > { %s45_s21 = sshll.u32 %s35_s20, 4  ;;  %s131_s29 = sshll.u32 %s251_s1, 4  ;;  %s46_s21 = int_to_ptr.vmem [resolvable:$true] %s45_s21  ;;  %s132_s29 = int_to_ptr.vmem [resolvable:$false] %s131_s29 }
  0x12   : > { %s127_s26 = scalar_lea.vmem %s46_s21, 16  ;;  %s133_s30 = scalar_lea.vmem %s132_s29, 256 }
  0x13   : > { %p128_p6 = scmp.ne.s32.totalorder %s46_s21, %s127_s26  ;;  %p134_p9 = scmp.lt.s32.totalorder %s46_s21, %s132_s29 }
  0x14   : > { %p135_p10 = scmp.lt.s32.totalorder %s133_s30, %s127_s26 }
  0x16   : > { %p31_p5 = scmp.ge.s32.totalorder %s216_s0, 0  ;;  %s84_s22 = sshll.u32 %s216_s0, 4 }
  0x17   : > { %s37_s25 = scalar_lea.hbm %s253_s3, %s84_s22  ;;  %p136_p11 = por %p135_p10, %p134_p9 }
  0x18   : > { %p129_p7 = pnand %p128_p6, %p31_p5 }
  0x1a   : > { %p130_p8 = pneg %p129_p7 }
  0x1c   : > { %p137_p12 = pnand %p136_p11, %p130_p8 }
  0x1e   : > { %140 = shalt.err (!%p137_p12)  }
  0x1f   : > { %s141_s4 = scalar_lea.hbm %s37_s25, 16  ;;  %s145_s7 = scalar_lea.hbm %s253_s3, 384 }
  0x20   : > { %p142_p13 = scmp.ne.s32.totalorder %s37_s25, %s141_s4  ;;  %p146_p2 = scmp.lt.s32.totalorder %s37_s25, %s253_s3 }
  0x21   : > { %p147_p3 = scmp.lt.s32.totalorder %s145_s7, %s141_s4 }
  0x22   : > { %p143_p0 = pnand %p142_p13, %p31_p5 }
  0x23   : > { %p148_p4 = por %p147_p3, %p146_p2 }
  0x24   : > { %p144_p1 = pneg %p143_p0 }
  0x26   : > { %p149_p6 = pnand %p148_p4, %p144_p1 }
  0x28   : > { %152 = shalt.err (!%p149_p6)  }
  0x29   : > { %88 = dma.vmem_to_hbm [thread:$0]  (%p31_p5), %s46_s21, 16, %s37_s25, [#allocation2] }
  0x2a   : > { %s49_s10 = scalar_select %p31_p5, 1, 0 }
  0x2b   : > { %s28_s17 = sadd.s32 1, %s175_s17  }
  0x2c   : > { %s50_s11 = sadd.s32 %s171_s2, %s49_s10   ;;  %p25_p7 = scmp.ge.s32.totalorder %s28_s17, 16  }
  0x2d   : > { %s254_s2 = smov %s50_s11  ;;  %p85_p8 = scmp.le.s32.totalorder (%p25_p7), %s50_s11, 0 }
  0x2e   :  { %27 = sbr.rel (!%p25_p7) target bundleno = 16 (0x10), region = 44 }
  0x33   :  { %80 = sbr.rel (%p85_p8) target bundleno = 65 (0x41), region = 49  ;;  %s177_s12 = smov (!%p85_p8), 0  }
  0x38 LB: > { %167 = dma.done.wait [#allocation2], 16  ;;  %s179_s12 = sphi %s177_s12, %s54_s12  }
  0x39   : > { %168 = vsyncadd [#allocation2], 4294967280  ;;  %s54_s12 = sadd.s32 1, %s179_s12  }
  0x3a   : > { %p53_p9 = scmp.ge.s32.totalorder %s54_s12, %s50_s11 }
  0x3c   :  { %56 = sbr.rel (!%p53_p9) target bundleno = 56 (0x38), region = 55 }
  0x41 PF:  { %60 = vsyncpa [#allocation4], 1 }
  0x42   :  { %61 = vsyncmov [#allocation2] }
  0x45   :  { %s62_s13 = vpop.sfrf %61 }
  0x46   :  { %p86_p5 = scmp.ne.s32.totalorder %s62_s13, 0 }
  0x48   :  { %66 = shalt.err (%p86_p5)  }

</bundles_post_ra>
